<compile_context>
chip_gen: v7x
topology: tpu7x:2x2x1
jax: 0.10.0
libtpu: 0.0.40
codegen_flags: <defaults>
</compile_context>

<pallas_src>
import numpy as np
import jax
import jax.numpy as jnp
from jax.experimental import pallas as pl
from jax.experimental.pallas import tpu as pltpu

_SLOPE = 0.2
_INV_SQRT2 = 1.0 / np.sqrt(2.0)


def _leaky_relu(x, slope=_SLOPE):
    return jnp.where(x >= 0, x, slope * x)


def down_conv_block_kernel(x_ref, bias1_ref, w1b_ref, w2b_ref, b2_ref, wsb_ref,
                           out_ref):
    # Per-grid-step (Bt images), width-packed lane-dense layout:
    #   x_ref    : (Bt, H, W*Cin)     f32 raw rows, lane = w*Cin + i  (no padding)
    #   bias1_ref: (Bt, 1, W*Cout)    f32 tile_W(b1 + t_emb@Wd + bd)  (per image)
    #   w1b_ref  : (3, W*Cin,  W*Cout) bf16 banded conv1 weight, one slab per dy
    #   w2b_ref  : (3, W*Cout, W*Cout) bf16 banded conv2 weight
    #   b2_ref   : (1, W*Cout)        f32 tile_W(b2)
    #   wsb_ref  : (W*Cin, W*Cout)    bf16 banded 1x1 skip weight
    #   out_ref  : (Bt, H, W*Cout)    f32, lane = w*Cout + o
    # Batch and height are flattened to one M = Bt*H sublane axis so every MXU
    # pass sees M rows; horizontal zero padding lives in the weight bands and
    # vertical zero padding is roll + per-image (row % H) boundary masks.
    bt, H, Kin = x_ref.shape
    WCo = out_ref.shape[2]
    M = bt * H

    x = x_ref[...].reshape(M, Kin)            # raw rows (conv1 / skip input)
    a = _leaky_relu(x)

    def vertical_taps(v, width):
        # v[h-1] / v[h+1] with per-image zero padding; masks stop cross-image
        # (and slab wrap-around) leakage from the rolls.
        r = jax.lax.broadcasted_iota(jnp.int32, (M, width), 0) % H
        dn = jnp.where(r == 0, 0.0, pltpu.roll(v, 1, axis=0))            # v[h-1]
        up = jnp.where(r == H - 1, 0.0, pltpu.roll(v, M - 1, axis=0))    # v[h+1]
        return dn, up

    bf = lambda v: v.astype(jnp.bfloat16)     # bf16 MXU operands, f32 accumulate

    # ---- conv1 (3x3, SAME): 3 lane-dense matmuls, one per vertical tap ----
    a_dn, a_up = vertical_taps(a, Kin)
    acc = jnp.dot(bf(a_dn), w1b_ref[0], preferred_element_type=jnp.float32)
    acc = acc + jnp.dot(bf(a), w1b_ref[1], preferred_element_type=jnp.float32)
    acc = acc + jnp.dot(bf(a_up), w1b_ref[2], preferred_element_type=jnp.float32)
    bias1 = jnp.broadcast_to(bias1_ref[...], (bt, H, WCo)).reshape(M, WCo)
    a2 = _leaky_relu(acc + bias1)             # (M, W*Cout)

    # ---- conv2 (3x3, SAME): same banded / rolled scheme ----
    a2_dn, a2_up = vertical_taps(a2, WCo)
    acc2 = jnp.dot(bf(a2_dn), w2b_ref[0], preferred_element_type=jnp.float32)
    acc2 = acc2 + jnp.dot(bf(a2), w2b_ref[1], preferred_element_type=jnp.float32)
    acc2 = acc2 + jnp.dot(bf(a2_up), w2b_ref[2], preferred_element_type=jnp.float32)
    acc2 = acc2 + b2_ref[...]

    # ---- skip: 1x1 conv (no bias) on the RAW (un-activated) input ----
    skip = jnp.dot(bf(x), wsb_ref[...], preferred_element_type=jnp.float32)

    out = (acc2 + skip) * _INV_SQRT2
    out_ref[...] = out.reshape(bt, H, WCo).astype(out_ref.dtype)


def _make_banded_weights(w1, w2, wskip, W, dtype=jnp.bfloat16):
    """Expand conv weights into banded matrices acting on width-packed rows.

    Packed row layout: lane index = w * C + c.  All bands consume UN-padded
    rows — the horizontal zero padding is folded into the band (out-of-range
    taps are zero entries) — so no padded activations are ever materialized.
    Returns (w1b, w2b, wsb) with shapes
      (3, W*Cin, W*Cout), (3, W*Cout, W*Cout), (W*Cin, W*Cout), cast to `dtype`.
    """
    kh, kw, cin, cout = w1.shape
    wi = np.arange(W)[:, None]                # input width index
    wo = np.arange(W)[None, :]                # output width index
    # band[dy][wi*Ci + i, wo*Co + o] = w[dy, dx, i, o]  iff  wi == wo + dx - 1
    sel = np.stack([(wi == wo + dx - 1) for dx in range(kw)], 0).astype(np.float32)

    w1b = jnp.einsum('xpw,yxio->ypiwo', jnp.asarray(sel), w1)
    w1b = w1b.reshape(kh, W * cin, W * cout)
    w2b = jnp.einsum('xpw,yxio->ypiwo', jnp.asarray(sel), w2)
    w2b = w2b.reshape(kh, W * cout, W * cout)
    ssk = (wi == wo).astype(np.float32)       # 1x1: wi == wo
    wsb = jnp.einsum('pw,io->piwo', jnp.asarray(ssk), wskip)
    wsb = wsb.reshape(W * cin, W * cout)
    return w1b.astype(dtype), w2b.astype(dtype), wsb.astype(dtype)


def _pick_batch_tile(B, H, target_rows=256, min_rows=128):
    """Images per grid step: M = bt*H ~ MXU row dim, but keep >=2 'parallel'
    steps for v7x's two TensorCores whenever each step still gets >= min_rows."""
    bt = max(1, min(B, target_rows // max(H, 1)))
    while bt > 1 and B // bt < 2 and (bt // 2) * H >= min_rows:
        bt //= 2
    while B % bt:
        bt -= 1
    return bt


def down_conv_block(x, t_emb, params, batch_tile=None):
    """x: (B, H, W, Cin) float32 NHWC, t_emb: (B, T) float32."""
    B, H, W, Cin = x.shape
    Cout = params['w1'].shape[-1]
    Kin, WCo = W * Cin, W * Cout
    bt = batch_tile if batch_tile is not None else _pick_batch_tile(B, H)
    assert B % bt == 0

    # ---- wrapper-side glue: layout plumbing + one-time parameter prep ----
    x_pk = x.reshape(B, H, Kin)               # width-packed rows; NO HBM padding

    w1b, w2b, wsb = _make_banded_weights(params['w1'], params['w2'],
                                         params['wskip'], W,
                                         dtype=jnp.bfloat16)

    # dense_t1(t_emb) hoisted out of the kernel and folded into the conv1 bias.
    tproj = t_emb @ params['wd'] + params['bd'].reshape(1, -1)      # (B, Cout)
    bias1 = jnp.tile(tproj + params['b1'].reshape(1, -1), (1, W))   # (B, W*Cout)
    bias1 = bias1.reshape(B, 1, WCo)
    b2 = jnp.tile(params['b2'].reshape(1, -1), (1, W))              # (1, W*Cout)

    out_pk = pl.pallas_call(
        down_conv_block_kernel,
        out_shape=jax.ShapeDtypeStruct((B, H, WCo), x.dtype),
        grid_spec=pltpu.PrefetchScalarGridSpec(
            num_scalar_prefetch=0,
            grid=(B // bt,),
            in_specs=[
                pl.BlockSpec((bt, H, Kin), lambda g: (g, 0, 0)),
                pl.BlockSpec((bt, 1, WCo), lambda g: (g, 0, 0)),
                pl.BlockSpec((3, Kin, WCo), lambda g: (0, 0, 0)),
                pl.BlockSpec((3, WCo, WCo), lambda g: (0, 0, 0)),
                pl.BlockSpec((1, WCo), lambda g: (0, 0)),
                pl.BlockSpec((Kin, WCo), lambda g: (0, 0)),
            ],
            out_specs=pl.BlockSpec((bt, H, WCo), lambda g: (g, 0, 0)),
        ),
        compiler_params=pltpu.CompilerParams(
            dimension_semantics=("parallel",),        # shard batch tiles on v7x
            vmem_limit_bytes=32 * 1024 * 1024),
    )(x_pk, bias1, w1b, w2b, b2, wsb)

    # Lane-dense (B, H, W*Cout) slab back to NHWC (metadata-only reshape).
    return out_pk.reshape(B, H, W, Cout)


def reference_forward(x, t_emb, params):
    """Pure-JAX f32 reference (NHWC / HWIO convs) for correctness checking."""
    act = lambda v: jnp.where(v >= 0, v, 0.2 * v)
    dn = ('NHWC', 'HWIO', 'NHWC')
    out = act(x)
    out = jax.lax.conv_general_dilated(out, params['w1'], (1, 1), 'SAME',
                                       dimension_numbers=dn)
    out = out + params['b1'].reshape(1, 1, 1, -1)
    tproj = t_emb @ params['wd'] + params['bd'].reshape(1, -1)
    out = out + tproj[:, None, None, :]
    out = act(out)
    out = jax.lax.conv_general_dilated(out, params['w2'], (1, 1), 'SAME',
                                       dimension_numbers=dn)
    out = out + params['b2'].reshape(1, 1, 1, -1)
    cin, cout = params['wskip'].shape
    skip = jax.lax.conv_general_dilated(x, params['wskip'].reshape(1, 1, cin, cout),
                                        (1, 1), 'SAME', dimension_numbers=dn)
    return (out + skip) / np.sqrt(2.0)


if __name__ == "__main__":
    # Small shapes consistent with the module; W*Cout = 128 → fully lane-dense.
    B, Cin, Cout, H, W, T = 2, 4, 8, 16, 16, 128

    key = jax.random.PRNGKey(0)
    ks = jax.random.split(key, 9)
    # Deterministic synthetic parameters (conv2 gets a small scale, mirroring
    # init_scale=0.0 in the original module, but kept non-zero to exercise it).
    params = {
        'w1':    0.1  * jax.random.normal(ks[0], (3, 3, Cin, Cout), jnp.float32),
        'b1':    0.1  * jax.random.normal(ks[1], (1, Cout), jnp.float32),
        'wd':    0.05 * jax.random.normal(ks[2], (T, Cout), jnp.float32),
        'bd':    0.1  * jax.random.normal(ks[3], (1, Cout), jnp.float32),
        'w2':    0.01 * jax.random.normal(ks[4], (3, 3, Cout, Cout), jnp.float32),
        'b2':    0.01 * jax.random.normal(ks[5], (1, Cout), jnp.float32),
        'wskip': 0.1  * jax.random.normal(ks[6], (Cin, Cout), jnp.float32),
    }
    x = jax.random.normal(ks[7], (B, H, W, Cin), jnp.float32)       # NHWC
    t_emb = jax.random.normal(ks[8], (B, T), jnp.float32)

    out = down_conv_block(x, t_emb, params)
    out = jax.block_until_ready(out)

    ref = jax.block_until_ready(reference_forward(x, t_emb, params))
    assert out.shape == (B, H, W, Cout)
    # bf16 MXU operands with f32 accumulation → relaxed tolerance vs f32 ref.
    np.testing.assert_allclose(np.asarray(out), np.asarray(ref),
                               rtol=2e-2, atol=2e-2)

    print("KERNEL_OK")
</pallas_src>

<mosaic_0001>
module attributes {stable_mosaic.version = 11 : i64} {
  func.func @down_conv_block_kernel(%arg0: i32, %arg1: memref<2x16x64xf32, #tpu.memory_space<vmem>>, %arg2: memref<2x1x128xf32, #tpu.memory_space<vmem>>, %arg3: memref<3x64x128xbf16, #tpu.memory_space<vmem>>, %arg4: memref<3x128x128xbf16, #tpu.memory_space<vmem>>, %arg5: memref<1x128xf32, #tpu.memory_space<vmem>>, %arg6: memref<64x128xbf16, #tpu.memory_space<vmem>>, %arg7: memref<2x16x128xf32, #tpu.memory_space<vmem>>) attributes {dimension_semantics = [#tpu.dimension_semantics<parallel>], iteration_bounds = array<i64: 1>, scalar_prefetch = 0 : i64, scratch_operands = 0 : i64, tpu.core_type = #tpu.core_type<tc>, window_params = [{transform_indices = @transform_0, window_bounds = array<i64: 2, 16, 64>}, {transform_indices = @transform_1, window_bounds = array<i64: 2, 1, 128>}, {pipeline_mode = #tpu.pipeline_mode<synchronous>, transform_indices = @transform_2, window_bounds = array<i64: 3, 64, 128>}, {pipeline_mode = #tpu.pipeline_mode<synchronous>, transform_indices = @transform_3, window_bounds = array<i64: 3, 128, 128>}, {pipeline_mode = #tpu.pipeline_mode<synchronous>, transform_indices = @transform_4, window_bounds = array<i64: 1, 128>}, {pipeline_mode = #tpu.pipeline_mode<synchronous>, transform_indices = @transform_5, window_bounds = array<i64: 64, 128>}, {transform_indices = @transform_6, window_bounds = array<i64: 2, 16, 128>}]} {
    %c0 = arith.constant 0 : index
    %c0_0 = arith.constant 0 : index
    %c0_1 = arith.constant 0 : index
    %0 = vector.load %arg1[%c0, %c0_0, %c0_1] : memref<2x16x64xf32, #tpu.memory_space<vmem>>, vector<2x16x64xf32>
    %1 = vector.shape_cast %0 : vector<2x16x64xf32> to vector<32x64xf32>
    %cst = arith.constant 0.000000e+00 : f32
    %2 = vector.broadcast %cst : f32 to vector<32x64xf32>
    %3 = arith.cmpf oge, %1, %2 : vector<32x64xf32>
    %cst_2 = arith.constant 2.000000e-01 : f32
    %4 = vector.broadcast %cst_2 : f32 to vector<32x64xf32>
    %5 = arith.mulf %4, %1 : vector<32x64xf32>
    %6 = arith.select %3, %1, %5 : vector<32x64xi1>, vector<32x64xf32>
    %7 = tpu.iota {dimensions = array<i32: 0>} : vector<32x64xi32>
    %c16_i32 = arith.constant 16 : i32
    %c0_i32 = arith.constant 0 : i32
    %8 = arith.cmpi eq, %c16_i32, %c0_i32 : i32
    %c1_i32 = arith.constant 1 : i32
    %9 = arith.select %8, %c1_i32, %c16_i32 : i32
    %10 = vector.broadcast %9 : i32 to vector<32x64xi32>
    %11 = arith.remsi %7, %10 : vector<32x64xi32>
    %c0_i32_3 = arith.constant 0 : i32
    %12 = vector.broadcast %c0_i32_3 : i32 to vector<32x64xi32>
    %13 = arith.cmpi ne, %11, %12 : vector<32x64xi32>
    %c0_i32_4 = arith.constant 0 : i32
    %14 = vector.broadcast %c0_i32_4 : i32 to vector<32x64xi32>
    %15 = arith.cmpi slt, %11, %14 : vector<32x64xi32>
    %c0_i32_5 = arith.constant 0 : i32
    %16 = arith.cmpi slt, %9, %c0_i32_5 : i32
    %17 = vector.broadcast %16 : i1 to vector<32x64xi1>
    %18 = vector.broadcast %17 : vector<32x64xi1> to vector<32x64xi1>
    %19 = arith.xori %15, %18 : vector<32x64xi1>
    %20 = arith.andi %19, %13 : vector<32x64xi1>
    %21 = vector.broadcast %9 : i32 to vector<32x64xi32>
    %22 = arith.addi %11, %21 : vector<32x64xi32>
    %23 = arith.select %20, %22, %11 : vector<32x64xi1>, vector<32x64xi32>
    %c0_i32_6 = arith.constant 0 : i32
    %24 = vector.broadcast %c0_i32_6 : i32 to vector<32x64xi32>
    %25 = arith.cmpi eq, %23, %24 : vector<32x64xi32>
    %c1_i32_7 = arith.constant 1 : i32
    %26 = tpu.dynamic_rotate %6 by %c1_i32_7 dim 0 : vector<32x64xf32>, i32 -> vector<32x64xf32>
    %cst_8 = arith.constant 0.000000e+00 : f32
    %27 = vector.broadcast %cst_8 : f32 to vector<32x64xf32>
    %28 = arith.select %25, %27, %26 : vector<32x64xi1>, vector<32x64xf32>
    %c15_i32 = arith.constant 15 : i32
    %29 = vector.broadcast %c15_i32 : i32 to vector<32x64xi32>
    %30 = arith.cmpi eq, %23, %29 : vector<32x64xi32>
    %c31_i32 = arith.constant 31 : i32
    %31 = tpu.dynamic_rotate %6 by %c31_i32 dim 0 : vector<32x64xf32>, i32 -> vector<32x64xf32>
    %cst_9 = arith.constant 0.000000e+00 : f32
    %32 = vector.broadcast %cst_9 : f32 to vector<32x64xf32>
    %33 = arith.select %30, %32, %31 : vector<32x64xi1>, vector<32x64xf32>
    %34 = arith.truncf %28 : vector<32x64xf32> to vector<32x64xbf16>
    %c0_10 = arith.constant 0 : index
    %c0_11 = arith.constant 0 : index
    %c0_12 = arith.constant 0 : index
    %35 = vector.load %arg3[%c0_10, %c0_11, %c0_12] : memref<3x64x128xbf16, #tpu.memory_space<vmem>>, vector<1x64x128xbf16>
    %36 = vector.shape_cast %35 : vector<1x64x128xbf16> to vector<64x128xbf16>
    %cst_13 = arith.constant dense<0.000000e+00> : vector<32x128xf32>
    %37 = tpu.matmul %34, %36, %cst_13 {dimension_numbers = #tpu.dot_dimension_numbers<[1], [0], [0], [1], [0, 0, 1, 1], [], []>} : vector<32x64xbf16>, vector<64x128xbf16>, vector<32x128xf32> -> vector<32x128xf32>
    %38 = arith.truncf %6 : vector<32x64xf32> to vector<32x64xbf16>
    %c1 = arith.constant 1 : index
    %c0_14 = arith.constant 0 : index
    %c0_15 = arith.constant 0 : index
    %39 = vector.load %arg3[%c1, %c0_14, %c0_15] : memref<3x64x128xbf16, #tpu.memory_space<vmem>>, vector<1x64x128xbf16>
    %40 = vector.shape_cast %39 : vector<1x64x128xbf16> to vector<64x128xbf16>
    %cst_16 = arith.constant dense<0.000000e+00> : vector<32x128xf32>
    %41 = tpu.matmul %38, %40, %cst_16 {dimension_numbers = #tpu.dot_dimension_numbers<[1], [0], [0], [1], [0, 0, 1, 1], [], []>} : vector<32x64xbf16>, vector<64x128xbf16>, vector<32x128xf32> -> vector<32x128xf32>
    %42 = arith.addf %37, %41 : vector<32x128xf32>
    %43 = arith.truncf %33 : vector<32x64xf32> to vector<32x64xbf16>
    %c2 = arith.constant 2 : index
    %c0_17 = arith.constant 0 : index
    %c0_18 = arith.constant 0 : index
    %44 = vector.load %arg3[%c2, %c0_17, %c0_18] : memref<3x64x128xbf16, #tpu.memory_space<vmem>>, vector<1x64x128xbf16>
    %45 = vector.shape_cast %44 : vector<1x64x128xbf16> to vector<64x128xbf16>
    %cst_19 = arith.constant dense<0.000000e+00> : vector<32x128xf32>
    %46 = tpu.matmul %43, %45, %cst_19 {dimension_numbers = #tpu.dot_dimension_numbers<[1], [0], [0], [1], [0, 0, 1, 1], [], []>} : vector<32x64xbf16>, vector<64x128xbf16>, vector<32x128xf32> -> vector<32x128xf32>
    %47 = arith.addf %42, %46 : vector<32x128xf32>
    %c0_20 = arith.constant 0 : index
    %c0_21 = arith.constant 0 : index
    %c0_22 = arith.constant 0 : index
    %48 = vector.load %arg2[%c0_20, %c0_21, %c0_22] : memref<2x1x128xf32, #tpu.memory_space<vmem>>, vector<2x1x128xf32>
    %49 = vector.shape_cast %48 : vector<2x1x128xf32> to vector<2x1x128xf32>
    %50 = vector.broadcast %49 : vector<2x1x128xf32> to vector<2x16x128xf32>
    %51 = vector.shape_cast %50 : vector<2x16x128xf32> to vector<32x128xf32>
    %52 = arith.addf %47, %51 : vector<32x128xf32>
    %cst_23 = arith.constant 0.000000e+00 : f32
    %53 = vector.broadcast %cst_23 : f32 to vector<32x128xf32>
    %54 = arith.cmpf oge, %52, %53 : vector<32x128xf32>
    %cst_24 = arith.constant 2.000000e-01 : f32
    %55 = vector.broadcast %cst_24 : f32 to vector<32x128xf32>
    %56 = arith.mulf %55, %52 : vector<32x128xf32>
    %57 = arith.select %54, %52, %56 : vector<32x128xi1>, vector<32x128xf32>
    %58 = tpu.iota {dimensions = array<i32: 0>} : vector<32x128xi32>
    %c16_i32_25 = arith.constant 16 : i32
    %c0_i32_26 = arith.constant 0 : i32
    %59 = arith.cmpi eq, %c16_i32_25, %c0_i32_26 : i32
    %c1_i32_27 = arith.constant 1 : i32
    %60 = arith.select %59, %c1_i32_27, %c16_i32_25 : i32
    %61 = vector.broadcast %60 : i32 to vector<32x128xi32>
    %62 = arith.remsi %58, %61 : vector<32x128xi32>
    %c0_i32_28 = arith.constant 0 : i32
    %63 = vector.broadcast %c0_i32_28 : i32 to vector<32x128xi32>
    %64 = arith.cmpi ne, %62, %63 : vector<32x128xi32>
    %c0_i32_29 = arith.constant 0 : i32
    %65 = vector.broadcast %c0_i32_29 : i32 to vector<32x128xi32>
    %66 = arith.cmpi slt, %62, %65 : vector<32x128xi32>
    %c0_i32_30 = arith.constant 0 : i32
    %67 = arith.cmpi slt, %60, %c0_i32_30 : i32
    %68 = vector.broadcast %67 : i1 to vector<32x128xi1>
    %69 = vector.broadcast %68 : vector<32x128xi1> to vector<32x128xi1>
    %70 = arith.xori %66, %69 : vector<32x128xi1>
    %71 = arith.andi %70, %64 : vector<32x128xi1>
    %72 = vector.broadcast %60 : i32 to vector<32x128xi32>
    %73 = arith.addi %62, %72 : vector<32x128xi32>
    %74 = arith.select %71, %73, %62 : vector<32x128xi1>, vector<32x128xi32>
    %c0_i32_31 = arith.constant 0 : i32
    %75 = vector.broadcast %c0_i32_31 : i32 to vector<32x128xi32>
    %76 = arith.cmpi eq, %74, %75 : vector<32x128xi32>
    %c1_i32_32 = arith.constant 1 : i32
    %77 = tpu.dynamic_rotate %57 by %c1_i32_32 dim 0 : vector<32x128xf32>, i32 -> vector<32x128xf32>
    %cst_33 = arith.constant 0.000000e+00 : f32
    %78 = vector.broadcast %cst_33 : f32 to vector<32x128xf32>
    %79 = arith.select %76, %78, %77 : vector<32x128xi1>, vector<32x128xf32>
    %c15_i32_34 = arith.constant 15 : i32
    %80 = vector.broadcast %c15_i32_34 : i32 to vector<32x128xi32>
    %81 = arith.cmpi eq, %74, %80 : vector<32x128xi32>
    %c31_i32_35 = arith.constant 31 : i32
    %82 = tpu.dynamic_rotate %57 by %c31_i32_35 dim 0 : vector<32x128xf32>, i32 -> vector<32x128xf32>
    %cst_36 = arith.constant 0.000000e+00 : f32
    %83 = vector.broadcast %cst_36 : f32 to vector<32x128xf32>
    %84 = arith.select %81, %83, %82 : vector<32x128xi1>, vector<32x128xf32>
    %85 = arith.truncf %79 : vector<32x128xf32> to vector<32x128xbf16>
    %c0_37 = arith.constant 0 : index
    %c0_38 = arith.constant 0 : index
    %c0_39 = arith.constant 0 : index
    %86 = vector.load %arg4[%c0_37, %c0_38, %c0_39] : memref<3x128x128xbf16, #tpu.memory_space<vmem>>, vector<1x128x128xbf16>
    %87 = vector.shape_cast %86 : vector<1x128x128xbf16> to vector<128x128xbf16>
    %cst_40 = arith.constant dense<0.000000e+00> : vector<32x128xf32>
    %88 = tpu.matmul %85, %87, %cst_40 {dimension_numbers = #tpu.dot_dimension_numbers<[1], [0], [0], [1], [0, 0, 1, 1], [], []>} : vector<32x128xbf16>, vector<128x128xbf16>, vector<32x128xf32> -> vector<32x128xf32>
    %89 = arith.truncf %57 : vector<32x128xf32> to vector<32x128xbf16>
    %c1_41 = arith.constant 1 : index
    %c0_42 = arith.constant 0 : index
    %c0_43 = arith.constant 0 : index
    %90 = vector.load %arg4[%c1_41, %c0_42, %c0_43] : memref<3x128x128xbf16, #tpu.memory_space<vmem>>, vector<1x128x128xbf16>
    %91 = vector.shape_cast %90 : vector<1x128x128xbf16> to vector<128x128xbf16>
    %cst_44 = arith.constant dense<0.000000e+00> : vector<32x128xf32>
    %92 = tpu.matmul %89, %91, %cst_44 {dimension_numbers = #tpu.dot_dimension_numbers<[1], [0], [0], [1], [0, 0, 1, 1], [], []>} : vector<32x128xbf16>, vector<128x128xbf16>, vector<32x128xf32> -> vector<32x128xf32>
    %93 = arith.addf %88, %92 : vector<32x128xf32>
    %94 = arith.truncf %84 : vector<32x128xf32> to vector<32x128xbf16>
    %c2_45 = arith.constant 2 : index
    %c0_46 = arith.constant 0 : index
    %c0_47 = arith.constant 0 : index
    %95 = vector.load %arg4[%c2_45, %c0_46, %c0_47] : memref<3x128x128xbf16, #tpu.memory_space<vmem>>, vector<1x128x128xbf16>
    %96 = vector.shape_cast %95 : vector<1x128x128xbf16> to vector<128x128xbf16>
    %cst_48 = arith.constant dense<0.000000e+00> : vector<32x128xf32>
    %97 = tpu.matmul %94, %96, %cst_48 {dimension_numbers = #tpu.dot_dimension_numbers<[1], [0], [0], [1], [0, 0, 1, 1], [], []>} : vector<32x128xbf16>, vector<128x128xbf16>, vector<32x128xf32> -> vector<32x128xf32>
    %98 = arith.addf %93, %97 : vector<32x128xf32>
    %c0_49 = arith.constant 0 : index
    %c0_50 = arith.constant 0 : index
    %99 = vector.load %arg5[%c0_49, %c0_50] : memref<1x128xf32, #tpu.memory_space<vmem>>, vector<1x128xf32>
    %100 = vector.broadcast %99 : vector<1x128xf32> to vector<32x128xf32>
    %101 = arith.addf %98, %100 : vector<32x128xf32>
    %102 = arith.truncf %1 : vector<32x64xf32> to vector<32x64xbf16>
    %c0_51 = arith.constant 0 : index
    %c0_52 = arith.constant 0 : index
    %103 = vector.load %arg6[%c0_51, %c0_52] : memref<64x128xbf16, #tpu.memory_space<vmem>>, vector<64x128xbf16>
    %cst_53 = arith.constant dense<0.000000e+00> : vector<32x128xf32>
    %104 = tpu.matmul %102, %103, %cst_53 {dimension_numbers = #tpu.dot_dimension_numbers<[1], [0], [0], [1], [0, 0, 1, 1], [], []>} : vector<32x64xbf16>, vector<64x128xbf16>, vector<32x128xf32> -> vector<32x128xf32>
    %105 = arith.addf %101, %104 : vector<32x128xf32>
    %cst_54 = arith.constant 0.707106769 : f32
    %106 = vector.broadcast %cst_54 : f32 to vector<32x128xf32>
    %107 = arith.mulf %105, %106 : vector<32x128xf32>
    %108 = vector.shape_cast %107 : vector<32x128xf32> to vector<2x16x128xf32>
    %c0_55 = arith.constant 0 : index
    %c0_56 = arith.constant 0 : index
    %c0_57 = arith.constant 0 : index
    %109 = vector.load %arg7[%c0_55, %c0_56, %c0_57] : memref<2x16x128xf32, #tpu.memory_space<vmem>>, vector<2x16x128xf32>
    tpu.vector_store %arg7[%c0_55, %c0_56, %c0_57], %108 {strides = array<i32>} : memref<2x16x128xf32, #tpu.memory_space<vmem>>, vector<2x16x128xf32>,
    return
  }
  func.func @transform_0(%arg0: i32) -> (i32, i32, i32) {
    %c0_i32 = arith.constant 0 : i32
    %c0_i32_0 = arith.constant 0 : i32
    %c0_i32_1 = arith.constant 0 : i32
    return %arg0, %c0_i32, %c0_i32_0 : i32, i32, i32
  }
  func.func @transform_1(%arg0: i32) -> (i32, i32, i32) {
    %c0_i32 = arith.constant 0 : i32
    %c0_i32_0 = arith.constant 0 : i32
    %c0_i32_1 = arith.constant 0 : i32
    return %arg0, %c0_i32, %c0_i32_0 : i32, i32, i32
  }
  func.func @transform_2(%arg0: i32) -> (i32, i32, i32) {
    %c0_i32 = arith.constant 0 : i32
    %c0_i32_0 = arith.constant 0 : i32
    %c0_i32_1 = arith.constant 0 : i32
    %c0_i32_2 = arith.constant 0 : i32
    return %c0_i32, %c0_i32_0, %c0_i32_1 : i32, i32, i32
  }
  func.func @transform_3(%arg0: i32) -> (i32, i32, i32) {
    %c0_i32 = arith.constant 0 : i32
    %c0_i32_0 = arith.constant 0 : i32
    %c0_i32_1 = arith.constant 0 : i32
    %c0_i32_2 = arith.constant 0 : i32
    return %c0_i32, %c0_i32_0, %c0_i32_1 : i32, i32, i32
  }
  func.func @transform_4(%arg0: i32) -> (i32, i32) {
    %c0_i32 = arith.constant 0 : i32
    %c0_i32_0 = arith.constant 0 : i32
    %c0_i32_1 = arith.constant 0 : i32
    return %c0_i32, %c0_i32_0 : i32, i32
  }
  func.func @transform_5(%arg0: i32) -> (i32, i32) {
    %c0_i32 = arith.constant 0 : i32
    %c0_i32_0 = arith.constant 0 : i32
    %c0_i32_1 = arith.constant 0 : i32
    return %c0_i32, %c0_i32_0 : i32, i32
  }
  func.func @transform_6(%arg0: i32) -> (i32, i32, i32) {
    %c0_i32 = arith.constant 0 : i32
    %c0_i32_0 = arith.constant 0 : i32
    %c0_i32_1 = arith.constant 0 : i32
    return %arg0, %c0_i32, %c0_i32_0 : i32, i32, i32
  }
}

</mosaic_0001>

<bundles_post_ra>
// kernel: tpu_custom_call.1
= control target key start
LH: loop header
LB: loop body
LE: loop exit
PB: predicated region body
PF: predicated region fallthrough
CT: control target
= control target key end

     0   :  { %11 = vsyncpa [#allocation3], 0  ;;  %s1678_s0 = inlined_call_operand.hbm [shape: f32[2,16,64], index: 0, kind: input, shape index: {}]   ;;  %s1679_s1 = inlined_call_operand.vmem [shape: f32[2,1,128], index: 1, kind: input, shape index: {}]   ;;  %s1680_s2 = inlined_call_operand.hbm [shape: bf16[3,64,128], index: 2, kind: input, shape index: {}]   ;;  %s1681_s3 = inlined_call_operand.hbm [shape: bf16[3,128,128], index: 3, kind: input, shape index: {}]   ;;  %s1682_s4 = inlined_call_operand.vmem [shape: f32[1,128], index: 4, kind: input, shape index: {}]   ;;  %s1683_s5 = inlined_call_operand.hbm [shape: bf16[64,128], index: 5, kind: input, shape index: {}]   ;;  %s1684_s6 = inlined_call_operand.hbm [shape: f32[2,16,128], index: 6, kind: output, shape index: {}]  }
   0x1   :  { %12 = vsyncpa [#allocation6], 0 }
   0x2   :  { %13 = vsyncpa [#allocation9], 0 }
   0x3   :  { %14 = vsyncpa [#allocation4], 0  ;;  %s1414_s21 = smov [#allocation5]   ;;  %s1296_s25 = scalar_lea.hbm %s1680_s2, 1536 }
   0x4   :  { %s34_s22 = sshll.u32 %s1414_s21, 4  ;;  %p1297_p0 = scmp.ne.s32.totalorder %s1680_s2, %s1296_s25  ;;  %s35_s22 = int_to_ptr.vmem [resolvable:$true] %s34_s22 }
   0x5   :  { %p1300_p1 = scmp.lt.u32.totalorder %s1296_s25, %s1680_s2 }
   0x7   :  { %p1302_p2 = pnand %p1300_p1, %p1297_p0 }
   0x9   :  { %1305 = shalt.err (!%p1302_p2)
}
   0xa   :  { %s1306_s30 = scalar_lea.vmem %s35_s22, 1536  ;;  %p1311_p4 = scmp.lt.s32.totalorder %s35_s22, %s35_s22 }
   0xb   :  { %p1307_p3 = scmp.ne.s32.totalorder %s35_s22, %s1306_s30  ;;  %p1312_p5 = scmp.lt.s32.totalorder %s1306_s30, %s1306_s30 }
   0xd   :  { %p1313_p6 = por %p1312_p5, %p1311_p4 }
   0xf   :  { %p1314_p7 = pnand %p1313_p6, %p1307_p3 }
  0x11   :  { %1317 = shalt.err (!%p1314_p7)
}
  0x12   :  { %s1415_s7 = smov 64   ;;  %s1416_s8 = smov 4  }
  0x13   :  { %40 = dma.hbm_to_vmem [thread:$0]  %s1680_s2, 1536, %s35_s22, [#allocation6], %s1415_s7, %s1415_s7, %s1416_s8  }
  0x14   :  { %s1417_s11 = smov [#allocation2]   ;;  %s1318_s15 = scalar_lea.hbm %s1678_s0, 512 }
  0x15   :  { %s20_s12 = sshll.u32 %s1417_s11, 4  ;;  %p1319_p8 = scmp.ne.s32.totalorder %s1678_s0, %s1318_s15  ;;  %s21_s12 = int_to_ptr.vmem [resolvable:$true] %s20_s12 }
  0x16   :  { %p1322_p9 = scmp.lt.u32.totalorder %s1318_s15, %s1678_s0 }
  0x18   :  { %p1324_p10 = pnand %p1322_p9, %p1319_p8 }
  0x1a   :  { %1327 = shalt.err (!%p1324_p10)
}
  0x1b   :  { %s1328_s20 = scalar_lea.vmem %s21_s12, 512  ;;  %p1333_p12 = scmp.lt.s32.totalorder %s21_s12, %s21_s12 }
  0x1c   :  { %p1329_p11 = scmp.ne.s32.totalorder %s21_s12, %s1328_s20  ;;  %p1334_p13 = scmp.lt.s32.totalorder %s1328_s20, %s1328_s20 }
  0x1e   :  { %p1335_p0 = por %p1334_p13, %p1333_p12 }
  0x20   :  { %p1336_p1 = pnand %p1335_p0, %p1329_p11 }
  0x22   :  { %1339 = shalt.err (!%p1336_p1)
}
  0x23   :  { %s1418_s2 = smov 128   ;;  %s1419_s21 = smov 8  }
  0x24   :  { %26 = dma.hbm_to_vmem [thread:$0]  %s1678_s0, 512, %s21_s12, [#allocation3], %s1418_s2, %s1418_s2, %s1419_s21  }
  0x25   :  { %s1420_s24 = smov [#allocation7]   ;;  %s1421_s26 = smov [#allocation8]  }
  0x26   :  { %s46_s25 = sshll.u32 %s1420_s24, 4  ;;  %s60_s27 = sshll.u32 %s1421_s26, 4  ;;  %s47_s25 = int_to_ptr.vmem [resolvable:$true] %s46_s25  ;;  %s1489_s27 = int_to_ptr.vmem [resolvable:$true] %s60_s27 }
  0x27   :  { %s1340_s30 = scalar_lea.hbm %s1681_s3, 3072 }
  0x28   :  { %p1341_p2 = scmp.ne.s32.totalorder %s1681_s3, %s1340_s30  ;;  %p1344_p3 = scmp.lt.u32.totalorder %s1340_s30, %s1681_s3 }
  0x2a   :  { %p1346_p4 = pnand %p1344_p3, %p1341_p2 }
  0x2c   :  { %1349 = shalt.err (!%p1346_p4)
}
  0x2d   :  { %s1350_s0 = scalar_lea.vmem %s47_s25, 3072  ;;  %p1355_p6 = scmp.lt.s32.totalorder %s47_s25, %s47_s25 }
  0x2e   :  { %p1351_p5 = scmp.ne.s32.totalorder %s47_s25, %s1350_s0  ;;  %p1356_p7 = scmp.lt.s32.totalorder %s1350_s0, %s1350_s0 }
  0x30   :  { %p1357_p8 = por %p1356_p7, %p1355_p6 }
  0x32   :  { %p1358_p9 = pnand %p1357_p8, %p1351_p5 }
  0x34   :  { %1361 = shalt.err (!%p1358_p9)
}
  0x35   :  { %52 = dma.hbm_to_vmem [thread:$0]  %s1681_s3, 3072, %s47_s25, [#allocation6], %s1415_s7, %s1415_s7, %s1416_s8  }
  0x36   :  { %s1362_s17 = scalar_lea.hbm %s1683_s5, 512 }
  0x37   :  { %p1363_p10 = scmp.ne.s32.totalorder %s1683_s5, %s1362_s17  ;;  %p1366_p11 = scmp.lt.u32.totalorder %s1362_s17, %s1683_s5 }
  0x39   :  { %p1368_p12 = pnand %p1366_p11, %p1363_p10 }
  0x3b   :  { %1371 = shalt.err (!%p1368_p12)
}
  0x3c   :  { %s1372_s23 = scalar_lea.vmem %s1489_s27, 512  ;;  %p1377_p0 = scmp.lt.s32.totalorder %s1489_s27, %s1489_s27 }
  0x3d   :  { %p1373_p13 = scmp.ne.s32.totalorder %s1489_s27, %s1372_s23  ;;  %p1378_p1 = scmp.lt.s32.totalorder %s1372_s23, %s1372_s23 }
  0x3f   :  { %p1379_p2 = por %p1378_p1, %p1377_p0 }
  0x41   :  { %p1380_p3 = pnand %p1379_p2, %p1373_p13 }
  0x43   :  { %1383 = shalt.err (!%p1380_p3)
}
  0x44   :  { %66 = dma.hbm_to_vmem [thread:$0]  %s1683_s5, 512, %s1489_s27, [#allocation9], %s1415_s7, %s1415_s7, %s1416_s8  }
  0x45   :  { %1406 = dma.done.wait [#allocation3], 512  }
  0x46   :  { %1407 = vsyncadd [#allocation3], 4294966784 }
  0x47   :  { %1408 = dma.done.wait [#allocation6], 4608  }
  0x48   :  { %1409 = vsyncadd [#allocation6], 4294962688 }
  0x49   :  { %1410 = dma.done.wait [#allocation9], 512  }
  0x4a   :  { %1411 = vsyncadd [#allocation9], 4294966784  ;;  %v1256_v0 = vld [vmem:[#allocation5 + $0x20] sm:$0xff]   ;;  %v96_v1 = vlaneseq  ;;  %v1257_v2 = vld [vmem:[#allocation5 + $0x28] sm:$0xff]   ;;  %vm228_vm2 = vcmask 523264   ;;  %s1423_s27 = smov [#allocation10]  }
  0x4b   :  { %1114 = vmatprep.subr.bf16.mxu0 %v1256_v0  ;;  %v1258_v3 = vld [vmem:[#allocation5 + $0x30] sm:$0xff]   ;;  %v1526_v4 = vld [vmem:[#allocation2] sm:$0xff]  ;;  %v1528_v5 = vld [vmem:[#allocation2 + $0x8] sm:$0xff]  ;;  %s979_s28 = sshll.u32 %s1423_s27, 4  ;;  %s980_s28 = int_to_ptr.vmem [resolvable:$true] %s979_s28 }
  0x4c   :  { %1115 = vmatpush3.bf16.msra.mxu0 %v1256_v0  ;;  %v1530_v6 = vshrl.u32 %v96_v1, 7  ;;  %vm84_vm0 = vcmp.ge.f32.partialorder %v1526_v4, 0.0  ;;  %vm85_vm1 = vcmp.ge.f32.partialorder %v1528_v5, 0.0  ;;  %v88_v7 = vmul.f32 0.2, %v1526_v4  ;;  %v1536_v9 = vld [vmem:[#allocation2 + $0x10] sm:$0xff]  ;;  %p1389_p5 = scmp.lt.s32.totalorder %s980_s28, %s980_s28 }
  0x4d   :  { %1116 = vmatprep.subr.bf16.mxu0 %v1257_v2  ;;  %v89_v8 = vmul.f32 0.2, %v1528_v5  ;;  %v1544_v12 = vld [vmem:[#allocation2 + $0x18] sm:$0xff]  ;;  %v90_v13 = vmul.f32 0.2, %v1536_v9  ;;  %vm86_vm3 = vcmp.ge.f32.partialorder %v1536_v9, 0.0 }
  0x4e   :  { %v1539_v10 = vsel %vm84_vm0, %v1526_v4, %v88_v7  ;;  %v1259_v14 = vld [vmem:[#allocation5 + $0x38] sm:$0xff]   ;;  %v105_v16 = vand.u32 15, %v1530_v6  ;;  %vm87_vm4 = vcmp.ge.f32.partialorder %v1544_v12, 0.0  ;;  %v91_v19 = vmul.f32 0.2, %v1544_v12  ;;  %v1260_v23 = vld [vmem:[#allocation5] sm:$0xff]  }
  0x4f   :  { %v1542_v11 = vsel %vm85_vm1, %v1528_v5, %v89_v8  ;;  %v153_v15 = vrot.slane %v1539_v10, 7  ;;  %vm157_vm5 = vcmp.lt.s32.totalorder %v1530_v6, 1  ;;  %v99_v20 = vadd.s32 16, %v1530_v6  ;;  %v1261_v33 = vld [vmem:[#allocation5 + $0x8] sm:$0xff]   ;;  %v1269_v37 = vld [vmem:[#allocation7] sm:$0xff]   ;;  %v1262_v41 = vld [vmem:[#allocation5 + $0x10] sm:$0xff]  }
  0x50   :  { %1117 = vmatpush3.bf16.msra.mxu0 %v1257_v2  ;;  %v154_v17 = vrot.slane %v1542_v11, 7  ;;  %v193_v18 = vpack.c.bf16 %v1542_v11, %v1539_v10  ;;  %v1559_v21 = vsel %vm86_vm3, %v1536_v9, %v90_v13  ;;  %v1562_v22 = vsel %vm87_vm4, %v1544_v12, %v91_v19  ;;  %v1271_v40 = vld [vmem:[#allocation7 + $0x8] sm:$0xff]   ;;  %1170 = vmatprep.subr.bf16.mxu1 %v1269_v37  ;;  %v1273_v47 = vld [vmem:[#allocation7 + $0x10] sm:$0xff]   ;;  %v1263_v49 = vld [vmem:[#allocation5 + $0x18] sm:$0xff]  }
  0x51   :  { %1118 = vmatprep.subr.bf16.mxu0 %v1258_v3  ;;  %v156_v24 = vrot.slane %v1562_v22, 7  ;;  %vm1565_vm6 = vcmp.eq.s32.totalorder %v105_v16, 0  ;;  %v98_v26 = vadd.s32 8, %v1530_v6  ;;  %v194_v28 = vpack.c.bf16 %v1562_v22, %v1559_v21  ;;  %1171 = vmatpush3.bf16.msra.mxu1 %v1269_v37  ;;  %v1275_v53 = vld [vmem:[#allocation7 + $0x18] sm:$0xff]   ;;  %v1264_v54 = vld [vmem:[#allocation5 + $0x40] sm:$0xff]   ;;  %v1265_v59 = vld [vmem:[#allocation5 + $0x48] sm:$0xff]  }
  0x52   :  { %1122 = vmatprep.mubr.msk.bf16.mxu0 %vm228_vm2, %v193_v18  ;;  %v160_v27 = vsel %vm157_vm5, %v153_v15, %v154_v17  ;;  %v119_v31 = vand.u32 15, %v99_v20  ;;  %v100_v32 = vadd.s32 24, %v1530_v6  ;;  %v155_v36 = vrot.slane %v1559_v21, 7  ;;  %1172 = vmatprep.subr.bf16.mxu1 %v1271_v40  ;;  %v1277_v57 = vld [vmem:[#allocation7 + $0x20] sm:$0xff]   ;;  %v1266_v61 = vld [vmem:[#allocation5 + $0x50] sm:$0xff]   ;;  %v1267_v62 = vld [vmem:[#allocation5 + $0x58] sm:$0xff]  }
  0x53   :  { %v161_v29 = vsel %vm157_vm5, %v156_v24, %v153_v15  ;;  %v112_v35 = vand.u32 15, %v98_v26  ;;  %v171_v38 = vrot.slane %v1542_v11, 1  ;;  %v172_v39 = vrot.slane %v1559_v21, 1  ;;  %v1270_v8 = vld [vmem:[#allocation7 + $0x48] sm:$0xff]   ;;  %v1274_v11 = vld [vmem:[#allocation7 + $0x58] sm:$0xff]   ;;  %v1276_v13 = vld [vmem:[#allocation7 + $0x60] sm:$0xff]  }
  0x54   :  { %1119 = vmatpush3.bf16.msra.mxu0 %v1258_v3  ;;  %v162_v30 = vsel %vm1565_vm6, 0.0, %v161_v29  ;;  %vm174_vm7 = vcmp.lt.s32.totalorder %v1530_v6, 7  ;;  %vm1585_vm8 = vcmp.eq.s32.totalorder %v119_v31, 0  ;;  %v159_v43 = vsel %vm157_vm5, %v154_v17, %v155_v36  ;;  %v1268_v3 = vld [vmem:[#allocation7 + $0x40] sm:$0xff]   ;;  %v1279_v15 = vld [vmem:[#allocation7 + $0x28] sm:$0xff]   ;;  %v1280_v16 = vld [vmem:[#allocation7 + $0x70] sm:$0xff]  }
  0x55   :  { %1120 = vmatprep.subr.bf16.mxu0 %v1259_v14  ;;  %v183_v34 = vpack.c.bf16 %v160_v27, %v162_v30  ;;  %v126_v44 = vand.u32 15, %v100_v32  ;;  %vm1591_vm9 = vcmp.eq.s32.totalorder %v112_v35, 15  ;;  %v176_v46 = vsel %vm174_vm7, %v171_v38, %v172_v39  ;;  %1173 = vmatpush3.bf16.msra.mxu1 %v1271_v40  ;;  %v1281_v17 = vld [vmem:[#allocation7 + $0x30] sm:$0xff]   ;;  %v1282_v18 = vld [vmem:[#allocation7 + $0x78] sm:$0xff]   ;;  %v1284_v20 = vld [vmem:[#allocation7 + $0x80] sm:$0xff]  }
  0x56   :  { %v170_v48 = vrot.slane %v1539_v10, 1  ;;  %v173_v50 = vrot.slane %v1562_v22, 1  ;;  %v164_v51 = vsel %vm1585_vm8, 0.0, %v159_v43  ;;  %v180_v52 = vsel %vm1591_vm9, 0.0, %v176_v46  ;;  %1174 = vmatprep.subr.bf16.mxu1 %v1273_v47  ;;  %v1272_v10 = vld [vmem:[#allocation7 + $0x50] sm:$0xff]   ;;  %v1283_v19 = vld [vmem:[#allocation7 + $0x38] sm:$0xff]   ;;  %vm1029_vm15 = vmneg %vm1565_vm6 }
  0x57   :  { %v158_v55 = vsel %vm157_vm5, %v155_v36, %v156_v24  ;;  %vm1609_vm10 = vcmp.eq.s32.totalorder %v126_v44, 15  ;;  %v1012_v21 = vld [vmem:[%s1679_s1 + $0x1] ss:$0 sm:$0xff]  ;;  %v1011_v22 = vld [vmem:[%s1679_s1] ss:$0 sm:$0xff]  ;;  %vm1033_vm0 = vmneg %vm1585_vm8  ;;  %vm1422_vm3 = vmmov 1   ;;  %v874_v63 = vpack.c.bf16 %v1544_v12, %v1536_v9 }
  0x58   :  { %1121 = vmatpush3.bf16.msra.mxu0 %v1259_v14  ;;  %v177_v56 = vsel %vm174_vm7, %v170_v48, %v171_v38  ;;  %v184_v58 = vpack.c.bf16 %v158_v55, %v164_v51  ;;  %v178_v0 = vsel %vm174_vm7, %v173_v50, %v170_v48  ;;  %v175_v1 = vsel %vm174_vm7, %v172_v39, %v173_v50  ;;  %v1278_v14 = vld [vmem:[#allocation7 + $0x68] sm:$0xff]   ;;  %vm1045_vm1 = vmneg %vm1591_vm9  ;;  %v1286_v45 = vld [vmem:[#allocation7 + $0x90] sm:$0xff]  }
  0x59   :  { %1126 = vmatprep.subr.bf16.mxu0 %v1260_v23  ;;  %1175 = vmatpush3.bf16.msra.mxu1 %v1273_v47  ;;  %v363_v60 = vpack.c.bf16 %v180_v52, %v177_v56  ;;  %v182_v2 = vsel %vm1609_vm10, 0.0, %v178_v0  ;;  %vm1030_vm4 = vmpackc.low %vm1422_vm3, %vm1029_vm15  ;;  %v1287_v0 = vld [vmem:[#allocation7 + $0x98] sm:$0xff]   ;;  %v1288_v6 = vld [vmem:[#allocation7 + $0xa0] sm:$0xff]  }
  0x5a   :  { %1176 = vmatprep.subr.bf16.mxu1 %v1275_v53  ;;  %v364_v7 = vpack.c.bf16 %v182_v2, %v175_v1  ;;  %vm1034_vm6 = vmpackc.low %vm1422_vm3, %vm1033_vm0  ;;  %v1289_v1 = vld [vmem:[#allocation7 + $0xa8] sm:$0xff]   ;;  %v1290_v2 = vld [vmem:[#allocation7 + $0xb0] sm:$0xff]  }
  0x5b   :  { %1123 = vmatmul.mubr.msk.bf16.vlgmr.msra.gmra.mrb[0].mxu0 %vm228_vm2, %v194_v28 }
  0x5c   :  { %1127 = vmatpush3.bf16.msra.mxu0 %v1260_v23  ;;  %1134 = vmatprep.mubr.msk.bf16.mxu0 %vm228_vm2, %v183_v34 }
  0x5d   :  { %1128 = vmatprep.subr.bf16.mxu0 %v1261_v33  ;;  %1177 = vmatpush3.bf16.msra.mxu1 %v1275_v53 }
  0x5e   :  { %1178 = vmatprep.subr.bf16.mxu1 %v1277_v57 }
  0x60   :  { %1129 = vmatpush3.bf16.msra.mxu0 %v1261_v33 }
  0x61   :  { %1130 = vmatprep.subr.bf16.mxu0 %v1262_v41  ;;  %1179 = vmatpush3.bf16.msra.mxu1 %v1277_v57 }
  0x62   :  { %1180 = vmatprep.subr.bf16.mxu1 %v1279_v15 }
  0x64   :  { %1131 = vmatpush3.bf16.msra.mxu0 %v1262_v41 }
  0x65   :  { %1132 = vmatprep.subr.bf16.mxu0 %v1263_v49  ;;  %1181 = vmatpush3.bf16.msra.mxu1 %v1279_v15 }
  0x66   :  { %1182 = vmatprep.subr.bf16.mxu1 %v1281_v17 }
  0x68   :  { %1133 = vmatpush3.bf16.msra.mxu0 %v1263_v49 }
  0x69   :  { %1138 = vmatprep.subr.bf16.mxu0 %v1264_v54  ;;  %1183 = vmatpush3.bf16.msra.mxu1 %v1281_v17 }
  0x6a   :  { %1184 = vmatprep.subr.bf16.mxu1 %v1283_v19 }
  0x6b   :  { %1135 = vmatmul.mubr.msk.bf16.vlgmr.msra.gmra.mrb[0].mxu0 %vm228_vm2, %v184_v58 }
  0x6c   :  { %1139 = vmatpush3.bf16.msra.mxu0 %v1264_v54  ;;  %1146 = vmatprep.mubr.msk.bf16.mxu0 %vm228_vm2, %v363_v60 }
  0x6d   :  { %1140 = vmatprep.subr.bf16.mxu0 %v1265_v59  ;;  %1185 = vmatpush3.bf16.msra.mxu1 %v1283_v19 }
  0x6e   :  { %1190 = vmatprep.subr.bf16.mxu1 %v1284_v20 }
  0x70   :  { %1141 = vmatpush3.bf16.msra.mxu0 %v1265_v59 }
  0x71   :  { %1142 = vmatprep.subr.bf16.mxu0 %v1266_v61 }
  0x74   :  { %1143 = vmatpush3.bf16.msra.mxu0 %v1266_v61 }
  0x75   :  { %1144 = vmatprep.subr.bf16.mxu0 %v1267_v62 }
  0x78   :  { %1145 = vmatpush3.bf16.msra.mxu0 %v1267_v62  ;;  %v1285_v62 = vld [vmem:[#allocation7 + $0x88] sm:$0xff]  }
  0x79   :  { %1150 = vmatprep.subr.bf16.mxu0 %v1268_v3 }
  0x7b   :  { %1147 = vmatmul.mubr.msk.bf16.vlgmr.msra.gmra.mrb[0].mxu0 %vm228_vm2, %v364_v7  ;;  %v1292_v7 = vld [vmem:[#allocation8] sm:$0xff]  }
  0x7c   :  { %1151 = vmatpush3.bf16.msra.mxu0 %v1268_v3  ;;  %v1291_v3 = vld [vmem:[#allocation7 + $0xb8] sm:$0xff]  }
  0x7d   :  { %1152 = vmatprep.subr.bf16.mxu0 %v1270_v8 }
  0x80   :  { %1153 = vmatpush3.bf16.msra.mxu0 %v1270_v8  ;;  %v873_v8 = vpack.c.bf16 %v1528_v5, %v1526_v4 }
  0x81   :  { %1154 = vmatprep.subr.bf16.mxu0 %v1272_v10 }
  0x84   :  { %1155 = vmatpush3.bf16.msra.mxu0 %v1272_v10  ;;  %v1293_v10 = vld [vmem:[#allocation8 + $0x8] sm:$0xff]  }
  0x85   :  { %1156 = vmatprep.subr.bf16.mxu0 %v1274_v11 }
  0x88   :  { %1157 = vmatpush3.bf16.msra.mxu0 %v1274_v11  ;;  %v1294_v11 = vld [vmem:[#allocation8 + $0x10] sm:$0xff]  }
  0x89   :  { %1158 = vmatprep.subr.bf16.mxu0 %v1276_v13 }
  0x8c   :  { %1159 = vmatpush3.bf16.msra.mxu0 %v1276_v13  ;;  %v1295_v13 = vld [vmem:[#allocation8 + $0x18] sm:$0xff]  }
  0x8d   :  { %1160 = vmatprep.subr.bf16.mxu0 %v1278_v14 }
  0x90   :  { %1161 = vmatpush3.bf16.msra.mxu0 %v1278_v14 }
  0x91   :  { %1162 = vmatprep.subr.bf16.mxu0 %v1280_v16 }
  0x94   :  { %1163 = vmatpush3.bf16.msra.mxu0 %v1280_v16  ;;  %v1053_v16 = vld [vmem:[%s1682_s4] ss:$0 sm:$0xff]  ;;  %s1384_s4 = scalar_lea.vmem %s980_s28, 512 }
  0x95   :  { %1164 = vmatprep.subr.bf16.mxu0 %v1282_v18  ;;  %p1385_p4 = scmp.ne.s32.totalorder %s980_s28, %s1384_s4  ;;  %p1390_p6 = scmp.lt.s32.totalorder %s1384_s4, %s1384_s4 }
  0x97   :  { %p1391_p7 = por %p1390_p6, %p1389_p5 }
  0x98   :  { %1165 = vmatpush3.bf16.msra.mxu0 %v1282_v18 }
  0x99   :  { %p1392_p8 = pnand %p1391_p7, %p1385_p4 }
 0x14e   :  { %v1148_v23 = vpop.f32.mrb[0].mxu0 }
 0x14f   :  { %v473_v24 = vadd.f32 %v1148_v23, %v1012_v21  ;;  %v438_v26 = vpop.f32.mrb[1].mxu0 }
 0x150   :  { %v471_v27 = vadd.f32 %v1011_v22, %v438_v26  ;;  %v1149_v28 = vpop.f32.mrb[2].mxu0 }
 0x151   :  { %vm477_vm11 = vcmp.ge.f32.partialorder %v473_v24, 0.0  ;;  %v481_v29 = vmul.f32 0.2, %v473_v24  ;;  %v474_v30 = vadd.f32 %v1149_v28, %v1012_v21  ;;  %v441_v31 = vpop.f32.mrb[3].mxu0 }
 0x152   :  { %vm475_vm12 = vcmp.ge.f32.partialorder %v471_v27, 0.0  ;;  %v479_v32 = vmul.f32 0.2, %v471_v27  ;;  %v472_v33 = vadd.f32 %v1011_v22, %v441_v31 }
 0x153   :  { %v485_v34 = vsel %vm477_vm11, %v473_v24, %v481_v29  ;;  %vm478_vm13 = vcmp.ge.f32.partialorder %v474_v30, 0.0  ;;  %v482_v35 = vmul.f32 0.2, %v474_v30 }
 0x154   :  { %v483_v36 = vsel %vm475_vm12, %v471_v27, %v479_v32  ;;  %vm476_vm14 = vcmp.ge.f32.partialorder %v472_v33, 0.0  ;;  %v480_v39 = vmul.f32 0.2, %v472_v33  ;;  %v501_v41 = vrot.slane %v485_v34, 1 }
 0x155   :  { %v499_v37 = vrot.slane %v483_v36, 1  ;;  %v486_v38 = vsel %vm478_vm13, %v474_v30, %v482_v35  ;;  %v487_v40 = vrot.slane %v483_v36, 7  ;;  %v489_v47 = vrot.slane %v485_v34, 7 }
 0x156   :  { %v502_v43 = vrot.slane %v486_v38, 1  ;;  %v530_v44 = vpack.c.bf16 %v486_v38, %v485_v34  ;;  %v490_v46 = vrot.slane %v486_v38, 7  ;;  %v484_v48 = vsel %vm476_vm14, %v472_v33, %v480_v39 }
 0x157   :  { %v500_v51 = vrot.slane %v484_v48, 1  ;;  %v529_v52 = vpack.c.bf16 %v484_v48, %v483_v36  ;;  %v488_v53 = vrot.slane %v484_v48, 7 }
 0x158   :  { %v503_v49 = vsel %vm174_vm7, %v501_v41, %v502_v43  ;;  %v506_v50 = vsel %vm174_vm7, %v502_v43, %v499_v37  ;;  %v494_v54 = vsel %vm157_vm5, %v490_v46, %v487_v40  ;;  %v491_v55 = vsel %vm157_vm5, %v489_v47, %v490_v46 }
 0x159   :  { %v1051_v56 = vpack.c.bf16 %v506_v50, %v503_v49  ;;  %1166 = vmatprep.mubr.bf16.mxu0 %v529_v52  ;;  %v504_v57 = vsel %vm174_vm7, %v500_v51, %v501_v41  ;;  %v505_v58 = vsel %vm174_vm7, %v499_v37, %v500_v51  ;;  %v493_v25 = vsel %vm157_vm5, %v487_v40, %v488_v53  ;;  %vm1046_vm7 = vmpackc.low %vm1045_vm1, %vm1422_vm3 }
 0x15a   :  { %1167 = vmatmul.mubr.bf16.vlgmr.msra.gmra.mrb[4].mxu0 %v530_v44  ;;  %v492_v42 = vsel %vm157_vm5, %v488_v53, %v489_v47  ;;  %v1047_v59 = vpack.c.bf16 %v504_v57, %v505_v58  ;;  %v1031_v60 = vpack.c.bf16 %v493_v25, %v494_v54  ;;  %vm1049_vm5 = vmneg %vm1609_vm10 }
 0x15b   :  { %v1035_v61 = vpack.c.bf16 %v491_v55, %v492_v42  ;;  %vm1050_vm8 = vmpackc.low %vm1049_vm5, %vm1422_vm3 }
 0x15c   :  { %1186 = vmatprep.mubr.msk.bf16.mxu1 %vm1030_vm4, %v1031_v60 }
 0x15d   :  { %1187 = vmatmul.mubr.msk.bf16.vlgmr.msra.gmra.mrb[0].mxu1 %vm1034_vm6, %v1035_v61 }
 0x15e   :  { %1191 = vmatpush3.bf16.msra.mxu1 %v1284_v20  ;;  %1206 = vmatprep.mubr.msk.bf16.mxu1 %vm1046_vm7, %v1047_v59 }
 0x15f   :  { %1192 = vmatprep.subr.bf16.mxu1 %v1285_v62 }
 0x162   :  { %1193 = vmatpush3.bf16.msra.mxu1 %v1285_v62 }
 0x163   :  { %1194 = vmatprep.subr.bf16.mxu1 %v1286_v45 }
 0x166   :  { %1195 = vmatpush3.bf16.msra.mxu1 %v1286_v45 }
 0x167   :  { %1196 = vmatprep.subr.bf16.mxu1 %v1287_v0 }
 0x16a   :  { %1197 = vmatpush3.bf16.msra.mxu1 %v1287_v0 }
 0x16b   :  { %1198 = vmatprep.subr.bf16.mxu1 %v1288_v6 }
 0x16e   :  { %1199 = vmatpush3.bf16.msra.mxu1 %v1288_v6 }
 0x16f   :  { %1200 = vmatprep.subr.bf16.mxu1 %v1289_v1 }
 0x172   :  { %1201 = vmatpush3.bf16.msra.mxu1 %v1289_v1 }
 0x173   :  { %1202 = vmatprep.subr.bf16.mxu1 %v1290_v2 }
 0x176   :  { %1203 = vmatpush3.bf16.msra.mxu1 %v1290_v2 }
 0x177   :  { %1204 = vmatprep.subr.bf16.mxu1 %v1291_v3 }
 0x17a   :  { %1205 = vmatpush3.bf16.msra.mxu1 %v1291_v3 }
 0x17b   :  { %1210 = vmatprep.subr.bf16.mxu1 %v1292_v7 }
 0x17d   :  { %1207 = vmatmul.mubr.msk.bf16.vlgmr.msra.gmra.mrb[0].mxu1 %vm1050_vm8, %v1051_v56 }
 0x17e   :  { %1211 = vmatpush3.bf16.msra.mxu1 %v1292_v7  ;;  %1218 = vmatprep.mubr.msk.bf16.mxu1 %vm228_vm2, %v873_v8 }
 0x17f   :  { %1212 = vmatprep.subr.bf16.mxu1 %v1293_v10 }
 0x182   :  { %1213 = vmatpush3.bf16.msra.mxu1 %v1293_v10 }
 0x183   :  { %1214 = vmatprep.subr.bf16.mxu1 %v1294_v11 }
 0x186   :  { %1215 = vmatpush3.bf16.msra.mxu1 %v1294_v11 }
 0x187   :  { %1216 = vmatprep.subr.bf16.mxu1 %v1295_v13 }
 0x18a   :  { %1217 = vmatpush3.bf16.msra.mxu1 %v1295_v13 }
 0x18d   :  { %1219 = vmatmul.mubr.msk.bf16.vlgmr.msra.gmra.mrb[0].mxu1 %vm228_vm2, %v874_v63 }
 0x22d   :  { %v1168_v4 = vpop.f32.mrb[4].mxu0 }
 0x22e   :  { %v630_v5 = vpop.f32.mrb[5].mxu0  ;;  %v1222_v17 = vadd.f32 %v1168_v4, %v1053_v16 }
 0x22f   :  { %v1169_v14 = vpop.f32.mrb[6].mxu0  ;;  %v1224_v18 = vadd.f32 %v1053_v16, %v630_v5 }
 0x230   :  { %v633_v15 = vpop.f32.mrb[7].mxu0  ;;  %v1226_v20 = vadd.f32 %v1169_v14, %v1053_v16 }
 0x231   :  { %v1228_v23 = vadd.f32 %v1053_v16, %v633_v15 }
 0x260   :  { %v1220_v19 = vpop.f32.mrb[0].mxu1 }
 0x261   :  { %v1223_v21 = vadd.f32 %v1222_v17, %v1220_v19  ;;  %v947_v22 = vpop.f32.mrb[1].mxu1 }
 0x262   :  { %v1225_v24 = vadd.f32 %v1224_v18, %v947_v22  ;;  %v1221_v9 = vpop.f32.mrb[2].mxu1 }
 0x263   :  { %v968_v12 = vmul.f32 0.70710677, %v1223_v21  ;;  %v1227_v26 = vadd.f32 %v1226_v20, %v1221_v9  ;;  %v950_v27 = vpop.f32.mrb[3].mxu1 }
 0x264   :  { %v966_v28 = vmul.f32 0.70710677, %v1225_v24  ;;  %v1229_v29 = vadd.f32 %v1228_v23, %v950_v27 }
 0x265   :  { %972 = vst [vmem:[#allocation10 + $0x10] sm:$0xff] %v968_v12  ;;  %v969_v30 = vmul.f32 0.70710677, %v1227_v26 }
 0x266   :  { %970 = vst [vmem:[#allocation10] sm:$0xff] %v966_v28  ;;  %v967_v31 = vmul.f32 0.70710677, %v1229_v29 }
 0x267   :  { %973 = vst [vmem:[#allocation10 + $0x18] sm:$0xff] %v969_v30 }
 0x268   :  { %971 = vst [vmem:[#allocation10 + $0x8] sm:$0xff] %v967_v31 }
 0x269   :  { %1395 = shalt.err (!%p1392_p8)
}
 0x26a   :  { %s1396_s9 = scalar_lea.hbm %s1684_s6, 512 }
 0x26b   :  { %p1397_p9 = scmp.ne.s32.totalorder %s1684_s6, %s1396_s9  ;;  %p1400_p10 = scmp.lt.u32.totalorder %s1396_s9, %s1684_s6 }
 0x26d   :  { %p1402_p11 = pnand %p1400_p10, %p1397_p9 }
 0x26f   :  { %1405 = shalt.err (!%p1402_p11)
}
 0x270   :  { %985 = dma.vmem_to_hbm [thread:$0]  %s980_s28, 512, %s1684_s6, [#allocation4], %s1418_s2, %s1418_s2, %s1419_s21  }
 0x271   :  { %1412 = dma.done.wait [#allocation4], 512  }
 0x272   :  { %1413 = vsyncadd [#allocation4], 4294966784 }
 0x273   :  { %989 = vsyncpa [#allocation3], 1 }
 0x274   :  { %990 = vsyncpa [#allocation6], 1 }
 0x275   :  { %991 = vsyncpa [#allocation9], 1 }
 0x276   :  { %992 = vsyncpa [#allocation4], 1 }

</bundles_post_ra>
